<compile_context>
chip_gen: v5e
topology: v5e:2x2
jax: 0.10.0
libtpu: 0.0.40
codegen_flags: <defaults>
</compile_context>

<pallas_src>
import functools

import jax
import jax.numpy as jnp
from jax.experimental import pallas as pl
from jax.experimental.pallas import tpu as pltpu

LEAKY_SLOPE = 0.01
BN_EPS = 1e-5


def _cdiv(a, b):
    return (a + b - 1) // b


def _round_up(a, b):
    return _cdiv(a, b) * b


@functools.lru_cache(maxsize=1)
def _vmem_limit_bytes():
    # Generation-aware scoped-VMEM budget: 3/4 of physical, capped at 96 MiB.
    cap = 64 * 1024 * 1024          # conservative fallback (fits every gen)
    try:
        info = pltpu.get_tpu_info()
        cap = int(getattr(info, "vmem_capacity_bytes", cap))
    except Exception:
        pass
    return min(int(cap * 3 // 4), 96 * 1024 * 1024)


def _leaky_relu(x):
    return jnp.where(x > 0, x, LEAKY_SLOPE * x)


# ---------------------------------------------------------------------------
# Kernel 1: 3x(Linear + LeakyReLU) on transposed tiles + per-tile BN partials.
#           Grid: 1-D over edge tiles, fully "parallel" (v7x shards it).
#           All blocks are [feature, tile_e] -> lane-dense loads/stores,
#           MXU N-dim = tile_e.
# ---------------------------------------------------------------------------
def _edge_mlp_kernel(bond_ref, msg_ref, w1bt_ref, b1_ref, w2t_ref, b2_ref,
                     w3t_ref, b3_ref, y_ref, sum_ref, sq_ref,
                     *, n_edges, tile_e):
    i = pl.program_id(0)

    # x@W1 = bond@W1b + msg  (msg = (h[src]+h[dst])@W1a, pre-gathered in HBM).
    h = _leaky_relu(
        jnp.dot(w1bt_ref[...], bond_ref[...], preferred_element_type=jnp.float32)
        + msg_ref[...] + b1_ref[...])
    h = _leaky_relu(
        jnp.dot(w2t_ref[...], h, preferred_element_type=jnp.float32) + b2_ref[...])
    y = _leaky_relu(
        jnp.dot(w3t_ref[...], h, preferred_element_type=jnp.float32) + b3_ref[...])
    y_ref[...] = y                                           # [out_dim, tile_e]

    # --- BN partial statistics; padded edge columns masked out of the stats.
    col = i * tile_e + jax.lax.broadcasted_iota(jnp.int32, y.shape, 1)
    ym = jnp.where(col < n_edges, y, 0.0)
    ysq = ym * ym
    # Collapse lane-tile groups (tile_e -> 128 lanes) with plain vreg adds;
    # the final 128 -> 1 collapse happens in JAX on a tiny array.
    acc_s = ym[:, 0:128]
    acc_q = ysq[:, 0:128]
    for k in range(1, tile_e // 128):
        acc_s = acc_s + ym[:, k * 128:(k + 1) * 128]
        acc_q = acc_q + ysq[:, k * 128:(k + 1) * 128]
    sum_ref[...] = acc_s
    sq_ref[...] = acc_q


# ---------------------------------------------------------------------------
# Kernel 2: BatchNorm affine apply, lane-dense (edge axis on lanes),
#           output aliased onto the input buffer (true in-place).
# ---------------------------------------------------------------------------
def _bn_apply_kernel(y_ref, scale_ref, shift_ref, o_ref):
    o_ref[...] = y_ref[...] * scale_ref[...] + shift_ref[...]


def dti_conv_graph3_layer(atom_feats, bond_feats, src, dst, params,
                          *, tile_e=1024):
    """Forward pass of DTIConvGraph3Layer (dropout = identity / eval mode).

    atom_feats : [N, D_atom] f32
    bond_feats : [E, D_bond] f32
    src, dst   : [E] int32 edge endpoints
    params     : dict with w1,b1,w2,b2,w3,b3,gamma,beta
    """
    E, d_bond = bond_feats.shape
    N, _ = atom_feats.shape
    out_dim = params["w3"].shape[1]

    # --- tile sizing: multiple of 128 (edge axis = lanes); keep >=2 tiles when
    #     possible so v7x's 2 TensorCores both get work on the parallel axis.
    tile_e = min(int(tile_e), _round_up(_cdiv(E, 2), 128))
    tile_e = max(128, (tile_e // 128) * 128)
    n_tiles = _cdiv(E, tile_e)
    e_pad = n_tiles * tile_e
    pad = e_pad - E

    # --- split W1 along its input axis:  x = [bond, m]  ->  x@W1 = bond@W1b + m@W1a
    w1 = params["w1"]
    w1_bond_t = w1[:d_bond].T                                # [out, d_bond]
    w1_atom = w1[d_bond:]                                    # [d_atom, out]
    w2_t = params["w2"].T
    w3_t = params["w3"].T
    b1c = params["b1"].reshape(out_dim, 1)
    b2c = params["b2"].reshape(out_dim, 1)
    b3c = params["b3"].reshape(out_dim, 1)

    # --- pre-project atoms (tiny [N,out]) + pre-gather per-edge message proj.
    atom_proj = jnp.dot(atom_feats, w1_atom,
                        precision=jax.lax.Precision.HIGHEST)            # [N, out]
    src = src.astype(jnp.int32)
    dst = dst.astype(jnp.int32)
    msg = jnp.take(atom_proj, src, axis=0) + jnp.take(atom_proj, dst, axis=0)  # [E, out]

    # --- transposed (lane-dense) operands, padded along the edge axis.
    bond_tp = jnp.pad(bond_feats, ((0, pad), (0, 0))).T      # [d_bond, e_pad]
    msg_tp = jnp.pad(msg, ((0, pad), (0, 0))).T              # [out,    e_pad]

    vmem_limit = _vmem_limit_bytes()
    const2d = lambda i: (0, 0)
    edge_block = lambda i: (0, i)

    kernel = functools.partial(_edge_mlp_kernel, n_edges=E, tile_e=tile_e)
    y_t, s_part, sq_part = pl.pallas_call(
        kernel,
        out_shape=(
            jax.ShapeDtypeStruct((out_dim, e_pad), jnp.float32),
            jax.ShapeDtypeStruct((out_dim, n_tiles * 128), jnp.float32),
            jax.ShapeDtypeStruct((out_dim, n_tiles * 128), jnp.float32),
        ),
        grid_spec=pltpu.PrefetchScalarGridSpec(
            num_scalar_prefetch=0,
            grid=(n_tiles,),
            in_specs=[
                pl.BlockSpec((d_bond, tile_e), edge_block),    # bond^T tile
                pl.BlockSpec((out_dim, tile_e), edge_block),   # msg^T tile
                pl.BlockSpec((out_dim, d_bond), const2d),      # W1_bond^T (resident)
                pl.BlockSpec((out_dim, 1), const2d),           # b1
                pl.BlockSpec((out_dim, out_dim), const2d),     # W2^T
                pl.BlockSpec((out_dim, 1), const2d),           # b2
                pl.BlockSpec((out_dim, out_dim), const2d),     # W3^T
                pl.BlockSpec((out_dim, 1), const2d),           # b3
            ],
            out_specs=[
                pl.BlockSpec((out_dim, tile_e), edge_block),   # y^T
                pl.BlockSpec((out_dim, 128), edge_block),      # BN sum partials
                pl.BlockSpec((out_dim, 128), edge_block),      # BN sumsq partials
            ],
        ),
        compiler_params=pltpu.CompilerParams(
            dimension_semantics=("parallel",),
            vmem_limit_bytes=vmem_limit),
    )(bond_tp, msg_tp, w1_bond_t, b1c, w2_t, b2c, w3_t, b3c)

    # TODO(synk): nn.Dropout is stochastic in training; identity (eval mode) here.

    # --- BatchNorm1d training-style forward: batch mean, biased batch variance.
    s_tot = s_part.sum(axis=1)                               # [out_dim]
    sq_tot = sq_part.sum(axis=1)
    mean = s_tot / E
    # TODO(synk): E[y^2]-E[y]^2 can cancel for very large activations; a
    # two-pass / Welford variance would be safer if activation scales grow.
    var = jnp.maximum(sq_tot / E - mean * mean, 0.0)
    scale = params["gamma"] * jax.lax.rsqrt(var + BN_EPS)    # [out_dim]
    shift = params["beta"] - mean * scale

    # --- BN apply: lane-dense over the transposed y, aliased in place.
    out_t = pl.pallas_call(
        _bn_apply_kernel,
        out_shape=jax.ShapeDtypeStruct((out_dim, e_pad), jnp.float32),
        grid_spec=pltpu.PrefetchScalarGridSpec(
            num_scalar_prefetch=0,
            grid=(n_tiles,),
            in_specs=[
                pl.BlockSpec((out_dim, tile_e), edge_block),
                pl.BlockSpec((out_dim, 1), const2d),
                pl.BlockSpec((out_dim, 1), const2d),
            ],
            out_specs=pl.BlockSpec((out_dim, tile_e), edge_block),
        ),
        input_output_aliases={0: 0},
        compiler_params=pltpu.CompilerParams(
            dimension_semantics=("parallel",),
            vmem_limit_bytes=vmem_limit),
    )(y_t, scale.reshape(out_dim, 1), shift.reshape(out_dim, 1))

    # Back to the module's [E, out_dim] layout; padded edge columns dropped.
    return out_t[:, :E].T


def init_params(key, in_dim, out_dim):
    ks = jax.random.split(key, 6)

    def lin(kw, kb, fan_in, fan_out):
        bound = 1.0 / jnp.sqrt(fan_in)
        w = jax.random.uniform(kw, (fan_in, fan_out), jnp.float32, -bound, bound)
        b = jax.random.uniform(kb, (1, fan_out), jnp.float32, -bound, bound)
        return w, b

    w1, b1 = lin(ks[0], ks[1], in_dim, out_dim)
    w2, b2 = lin(ks[2], ks[3], out_dim, out_dim)
    w3, b3 = lin(ks[4], ks[5], out_dim, out_dim)
    return dict(w1=w1, b1=b1, w2=w2, b2=b2, w3=w3, b3=b3,
                gamma=jnp.ones((out_dim,), jnp.float32),
                beta=jnp.zeros((out_dim,), jnp.float32))


if __name__ == "__main__":
    key = jax.random.PRNGKey(0)
    k_atom, k_bond, k_src, k_dst, k_param = jax.random.split(key, 5)

    # Small, odd-sized graph to exercise tail padding, masking and a 2-tile grid.
    N, D_atom, D_bond, E = 24, 40, 24, 300
    in_dim = D_bond + D_atom          # MLP input = concat(edge feats, u+v message)
    out_dim = 32

    atom_feats = jax.random.normal(k_atom, (N, D_atom), jnp.float32)
    bond_feats = jax.random.normal(k_bond, (E, D_bond), jnp.float32)
    src = jax.random.randint(k_src, (E,), 0, N, jnp.int32)
    dst = jax.random.randint(k_dst, (E,), 0, N, jnp.int32)
    params = init_params(k_param, in_dim, out_dim)

    fwd = jax.jit(functools.partial(dti_conv_graph3_layer, tile_e=1024))
    out = fwd(atom_feats, bond_feats, src, dst, params)
    jax.block_until_ready(out)

    # ---- pure-JAX reference -------------------------------------------------
    m = atom_feats[src] + atom_feats[dst]
    x = jnp.concatenate([bond_feats, m], axis=1)
    h = x
    for wk, bk in (("w1", "b1"), ("w2", "b2"), ("w3", "b3")):
        z = jnp.dot(h, params[wk], precision=jax.lax.Precision.HIGHEST) + params[bk]
        h = jnp.where(z > 0, z, LEAKY_SLOPE * z)
    mean = h.mean(axis=0, keepdims=True)
    var = ((h - mean) ** 2).mean(axis=0, keepdims=True)
    ref = (h - mean) / jnp.sqrt(var + BN_EPS) * params["gamma"] + params["beta"]

    assert out.shape == (E, out_dim)
    assert jnp.allclose(out, ref, atol=1e-3, rtol=1e-3), "mismatch vs reference"

    print("KERNEL_OK")
</pallas_src>

<mosaic_0001>
module attributes {stable_mosaic.version = 11 : i64} {
  func.func @_bn_apply_kernel(%arg0: i32, %arg1: memref<32x256xf32, #tpu.memory_space<vmem>>, %arg2: memref<32x1xf32, #tpu.memory_space<vmem>>, %arg3: memref<32x1xf32, #tpu.memory_space<vmem>>, %arg4: memref<32x256xf32, #tpu.memory_space<vmem>>) attributes {dimension_semantics = [#tpu.dimension_semantics<parallel>], iteration_bounds = array<i64: 2>, scalar_prefetch = 0 : i64, scratch_operands = 0 : i64, tpu.core_type = #tpu.core_type<tc>, window_params = [{transform_indices = @transform_0, window_bounds = array<i64: 32, 256>}, {pipeline_mode = #tpu.pipeline_mode<synchronous>, transform_indices = @transform_1, window_bounds = array<i64: 32, 1>}, {pipeline_mode = #tpu.pipeline_mode<synchronous>, transform_indices = @transform_2, window_bounds = array<i64: 32, 1>}, {transform_indices = @transform_3, window_bounds = array<i64: 32, 256>}]} {
    %c0 = arith.constant 0 : index
    %c0_0 = arith.constant 0 : index
    %0 = vector.load %arg1[%c0, %c0_0] : memref<32x256xf32, #tpu.memory_space<vmem>>, vector<32x256xf32>
    %c0_1 = arith.constant 0 : index
    %c0_2 = arith.constant 0 : index
    %1 = vector.load %arg2[%c0_1, %c0_2] : memref<32x1xf32, #tpu.memory_space<vmem>>, vector<32x1xf32>
    %2 = vector.broadcast %1 : vector<32x1xf32> to vector<32x256xf32>
    %3 = arith.mulf %0, %2 : vector<32x256xf32>
    %c0_3 = arith.constant 0 : index
    %c0_4 = arith.constant 0 : index
    %4 = vector.load %arg3[%c0_3, %c0_4] : memref<32x1xf32, #tpu.memory_space<vmem>>, vector<32x1xf32>
    %5 = vector.broadcast %4 : vector<32x1xf32> to vector<32x256xf32>
    %6 = arith.addf %3, %5 : vector<32x256xf32>
    %c0_5 = arith.constant 0 : index
    %c0_6 = arith.constant 0 : index
    %7 = vector.load %arg4[%c0_5, %c0_6] : memref<32x256xf32, #tpu.memory_space<vmem>>, vector<32x256xf32>
    tpu.vector_store %arg4[%c0_5, %c0_6], %6 {strides = array<i32>} : memref<32x256xf32, #tpu.memory_space<vmem>>, vector<32x256xf32>,
    return
  }
  func.func @transform_0(%arg0: i32) -> (i32, i32) {
    %c0_i32 = arith.constant 0 : i32
    %c0_i32_0 = arith.constant 0 : i32
    return %c0_i32, %arg0 : i32, i32
  }
  func.func @transform_1(%arg0: i32) -> (i32, i32) {
    %c0_i32 = arith.constant 0 : i32
    %c0_i32_0 = arith.constant 0 : i32
    %c0_i32_1 = arith.constant 0 : i32
    return %c0_i32, %c0_i32_0 : i32, i32
  }
  func.func @transform_2(%arg0: i32) -> (i32, i32) {
    %c0_i32 = arith.constant 0 : i32
    %c0_i32_0 = arith.constant 0 : i32
    %c0_i32_1 = arith.constant 0 : i32
    return %c0_i32, %c0_i32_0 : i32, i32
  }
  func.func @transform_3(%arg0: i32) -> (i32, i32) {
    %c0_i32 = arith.constant 0 : i32
    %c0_i32_0 = arith.constant 0 : i32
    return %c0_i32, %arg0 : i32, i32
  }
}

module attributes {stable_mosaic.version = 11 : i64} {
  func.func @_edge_mlp_kernel(%arg0: i32, %arg1: memref<24x256xf32, #tpu.memory_space<vmem>>, %arg2: memref<32x256xf32, #tpu.memory_space<vmem>>, %arg3: memref<32x24xf32, #tpu.memory_space<vmem>>, %arg4: memref<32x1xf32, #tpu.memory_space<vmem>>, %arg5: memref<32x32xf32, #tpu.memory_space<vmem>>, %arg6: memref<32x1xf32, #tpu.memory_space<vmem>>, %arg7: memref<32x32xf32, #tpu.memory_space<vmem>>, %arg8: memref<32x1xf32, #tpu.memory_space<vmem>>, %arg9: memref<32x256xf32, #tpu.memory_space<vmem>>, %arg10: memref<32x128xf32, #tpu.memory_space<vmem>>, %arg11: memref<32x128xf32, #tpu.memory_space<vmem>>) attributes {dimension_semantics = [#tpu.dimension_semantics<parallel>], iteration_bounds = array<i64: 2>, scalar_prefetch = 0 : i64, scratch_operands = 0 : i64, tpu.core_type = #tpu.core_type<tc>, window_params = [{transform_indices = @transform_0, window_bounds = array<i64: 24, 256>}, {transform_indices = @transform_1, window_bounds = array<i64: 32, 256>}, {pipeline_mode = #tpu.pipeline_mode<synchronous>, transform_indices = @transform_2, window_bounds = array<i64: 32, 24>}, {pipeline_mode = #tpu.pipeline_mode<synchronous>, transform_indices = @transform_3, window_bounds = array<i64: 32, 1>}, {pipeline_mode = #tpu.pipeline_mode<synchronous>, transform_indices = @transform_4, window_bounds = array<i64: 32, 32>}, {pipeline_mode = #tpu.pipeline_mode<synchronous>, transform_indices = @transform_5, window_bounds = array<i64: 32, 1>}, {pipeline_mode = #tpu.pipeline_mode<synchronous>, transform_indices = @transform_6, window_bounds = array<i64: 32, 32>}, {pipeline_mode = #tpu.pipeline_mode<synchronous>, transform_indices = @transform_7, window_bounds = array<i64: 32, 1>}, {transform_indices = @transform_8, window_bounds = array<i64: 32, 256>}, {transform_indices = @transform_9, window_bounds = array<i64: 32, 128>}, {transform_indices = @transform_10, window_bounds = array<i64: 32, 128>}]} {
    %c0 = arith.constant 0 : index
    %c0_0 = arith.constant 0 : index
    %0 = vector.load %arg3[%c0, %c0_0] : memref<32x24xf32, #tpu.memory_space<vmem>>, vector<32x24xf32>
    %c0_1 = arith.constant 0 : index
    %c0_2 = arith.constant 0 : index
    %1 = vector.load %arg1[%c0_1, %c0_2] : memref<24x256xf32, #tpu.memory_space<vmem>>, vector<24x256xf32>
    %cst = arith.constant dense<0.000000e+00> : vector<32x256xf32>
    %2 = tpu.matmul %0, %1, %cst {dimension_numbers = #tpu.dot_dimension_numbers<[1], [0], [0], [1], [0, 0, 1, 1], [], []>} : vector<32x24xf32>, vector<24x256xf32>, vector<32x256xf32> -> vector<32x256xf32>
    %c0_3 = arith.constant 0 : index
    %c0_4 = arith.constant 0 : index
    %3 = vector.load %arg2[%c0_3, %c0_4] : memref<32x256xf32, #tpu.memory_space<vmem>>, vector<32x256xf32>
    %4 = arith.addf %2, %3 : vector<32x256xf32>
    %c0_5 = arith.constant 0 : index
    %c0_6 = arith.constant 0 : index
    %5 = vector.load %arg4[%c0_5, %c0_6] : memref<32x1xf32, #tpu.memory_space<vmem>>, vector<32x1xf32>
    %6 = vector.broadcast %5 : vector<32x1xf32> to vector<32x256xf32>
    %7 = arith.addf %4, %6 : vector<32x256xf32>
    %cst_7 = arith.constant 0.000000e+00 : f32
    %8 = vector.broadcast %cst_7 : f32 to vector<32x256xf32>
    %9 = arith.cmpf ogt, %7, %8 : vector<32x256xf32>
    %cst_8 = arith.constant 0.00999999977 : f32
    %10 = vector.broadcast %cst_8 : f32 to vector<32x256xf32>
    %11 = arith.mulf %10, %7 : vector<32x256xf32>
    %12 = arith.select %9, %7, %11 : vector<32x256xi1>, vector<32x256xf32>
    %c0_9 = arith.constant 0 : index
    %c0_10 = arith.constant 0 : index
    %13 = vector.load %arg5[%c0_9, %c0_10] : memref<32x32xf32, #tpu.memory_space<vmem>>, vector<32x32xf32>
    %cst_11 = arith.constant dense<0.000000e+00> : vector<32x256xf32>
    %14 = tpu.matmul %13, %12, %cst_11 {dimension_numbers = #tpu.dot_dimension_numbers<[1], [0], [0], [1], [0, 0, 1, 1], [], []>} : vector<32x32xf32>, vector<32x256xf32>, vector<32x256xf32> -> vector<32x256xf32>
    %c0_12 = arith.constant 0 : index
    %c0_13 = arith.constant 0 : index
    %15 = vector.load %arg6[%c0_12, %c0_13] : memref<32x1xf32, #tpu.memory_space<vmem>>, vector<32x1xf32>
    %16 = vector.broadcast %15 : vector<32x1xf32> to vector<32x256xf32>
    %17 = arith.addf %14, %16 : vector<32x256xf32>
    %cst_14 = arith.constant 0.000000e+00 : f32
    %18 = vector.broadcast %cst_14 : f32 to vector<32x256xf32>
    %19 = arith.cmpf ogt, %17, %18 : vector<32x256xf32>
    %cst_15 = arith.constant 0.00999999977 : f32
    %20 = vector.broadcast %cst_15 : f32 to vector<32x256xf32>
    %21 = arith.mulf %20, %17 : vector<32x256xf32>
    %22 = arith.select %19, %17, %21 : vector<32x256xi1>, vector<32x256xf32>
    %c0_16 = arith.constant 0 : index
    %c0_17 = arith.constant 0 : index
    %23 = vector.load %arg7[%c0_16, %c0_17] : memref<32x32xf32, #tpu.memory_space<vmem>>, vector<32x32xf32>
    %cst_18 = arith.constant dense<0.000000e+00> : vector<32x256xf32>
    %24 = tpu.matmul %23, %22, %cst_18 {dimension_numbers = #tpu.dot_dimension_numbers<[1], [0], [0], [1], [0, 0, 1, 1], [], []>} : vector<32x32xf32>, vector<32x256xf32>, vector<32x256xf32> -> vector<32x256xf32>
    %c0_19 = arith.constant 0 : index
    %c0_20 = arith.constant 0 : index
    %25 = vector.load %arg8[%c0_19, %c0_20] : memref<32x1xf32, #tpu.memory_space<vmem>>, vector<32x1xf32>
    %26 = vector.broadcast %25 : vector<32x1xf32> to vector<32x256xf32>
    %27 = arith.addf %24, %26 : vector<32x256xf32>
    %cst_21 = arith.constant 0.000000e+00 : f32
    %28 = vector.broadcast %cst_21 : f32 to vector<32x256xf32>
    %29 = arith.cmpf ogt, %27, %28 : vector<32x256xf32>
    %cst_22 = arith.constant 0.00999999977 : f32
    %30 = vector.broadcast %cst_22 : f32 to vector<32x256xf32>
    %31 = arith.mulf %30, %27 : vector<32x256xf32>
    %32 = arith.select %29, %27, %31 : vector<32x256xi1>, vector<32x256xf32>
    %c0_23 = arith.constant 0 : index
    %c0_24 = arith.constant 0 : index
    %33 = vector.load %arg9[%c0_23, %c0_24] : memref<32x256xf32, #tpu.memory_space<vmem>>, vector<32x256xf32>
    tpu.vector_store %arg9[%c0_23, %c0_24], %32 {strides = array<i32>} : memref<32x256xf32, #tpu.memory_space<vmem>>, vector<32x256xf32>,
    %c256_i32 = arith.constant 256 : i32
    %34 = arith.muli %arg0, %c256_i32 : i32
    %35 = tpu.iota {dimensions = array<i32: 1>} : vector<32x256xi32>
    %36 = vector.broadcast %34 : i32 to vector<32x256xi32>
    %37 = arith.addi %36, %35 : vector<32x256xi32>
    %c300_i32 = arith.constant 300 : i32
    %38 = vector.broadcast %c300_i32 : i32 to vector<32x256xi32>
    %39 = arith.cmpi slt, %37, %38 : vector<32x256xi32>
    %cst_25 = arith.constant 0.000000e+00 : f32
    %40 = vector.broadcast %cst_25 : f32 to vector<32x256xf32>
    %41 = arith.select %39, %32, %40 : vector<32x256xi1>, vector<32x256xf32>
    %42 = arith.mulf %41, %41 : vector<32x256xf32>
    %43 = vector.extract_strided_slice %41 {offsets = [0, 0], sizes = [32, 128], strides = [1, 1]} : vector<32x256xf32> to vector<32x128xf32>
    %44 = vector.extract_strided_slice %42 {offsets = [0, 0], sizes = [32, 128], strides = [1, 1]} : vector<32x256xf32> to vector<32x128xf32>
    %45 = vector.extract_strided_slice %41 {offsets = [0, 128], sizes = [32, 128], strides = [1, 1]} : vector<32x256xf32> to vector<32x128xf32>
    %46 = arith.addf %43, %45 : vector<32x128xf32>
    %47 = vector.extract_strided_slice %42 {offsets = [0, 128], sizes = [32, 128], strides = [1, 1]} : vector<32x256xf32> to vector<32x128xf32>
    %48 = arith.addf %44, %47 : vector<32x128xf32>
    %c0_26 = arith.constant 0 : index
    %c0_27 = arith.constant 0 : index
    %49 = vector.load %arg10[%c0_26, %c0_27] : memref<32x128xf32, #tpu.memory_space<vmem>>, vector<32x128xf32>
    tpu.vector_store %arg10[%c0_26, %c0_27], %46 {strides = array<i32>} : memref<32x128xf32, #tpu.memory_space<vmem>>, vector<32x128xf32>,
    %c0_28 = arith.constant 0 : index
    %c0_29 = arith.constant 0 : index
    %50 = vector.load %arg11[%c0_28, %c0_29] : memref<32x128xf32, #tpu.memory_space<vmem>>, vector<32x128xf32>
    tpu.vector_store %arg11[%c0_28, %c0_29], %48 {strides = array<i32>} : memref<32x128xf32, #tpu.memory_space<vmem>>, vector<32x128xf32>,
    return
  }
  func.func @transform_0(%arg0: i32) -> (i32, i32) {
    %c0_i32 = arith.constant 0 : i32
    %c0_i32_0 = arith.constant 0 : i32
    return %c0_i32, %arg0 : i32, i32
  }
  func.func @transform_1(%arg0: i32) -> (i32, i32) {
    %c0_i32 = arith.constant 0 : i32
    %c0_i32_0 = arith.constant 0 : i32
    return %c0_i32, %arg0 : i32, i32
  }
  func.func @transform_2(%arg0: i32) -> (i32, i32) {
    %c0_i32 = arith.constant 0 : i32
    %c0_i32_0 = arith.constant 0 : i32
    %c0_i32_1 = arith.constant 0 : i32
    return %c0_i32, %c0_i32_0 : i32, i32
  }
  func.func @transform_3(%arg0: i32) -> (i32, i32) {
    %c0_i32 = arith.constant 0 : i32
    %c0_i32_0 = arith.constant 0 : i32
    %c0_i32_1 = arith.constant 0 : i32
    return %c0_i32, %c0_i32_0 : i32, i32
  }
  func.func @transform_4(%arg0: i32) -> (i32, i32) {
    %c0_i32 = arith.constant 0 : i32
    %c0_i32_0 = arith.constant 0 : i32
    %c0_i32_1 = arith.constant 0 : i32
    return %c0_i32, %c0_i32_0 : i32, i32
  }
  func.func @transform_5(%arg0: i32) -> (i32, i32) {
    %c0_i32 = arith.constant 0 : i32
    %c0_i32_0 = arith.constant 0 : i32
    %c0_i32_1 = arith.constant 0 : i32
    return %c0_i32, %c0_i32_0 : i32, i32
  }
  func.func @transform_6(%arg0: i32) -> (i32, i32) {
    %c0_i32 = arith.constant 0 : i32
    %c0_i32_0 = arith.constant 0 : i32
    %c0_i32_1 = arith.constant 0 : i32
    return %c0_i32, %c0_i32_0 : i32, i32
  }
  func.func @transform_7(%arg0: i32) -> (i32, i32) {
    %c0_i32 = arith.constant 0 : i32
    %c0_i32_0 = arith.constant 0 : i32
    %c0_i32_1 = arith.constant 0 : i32
    return %c0_i32, %c0_i32_0 : i32, i32
  }
  func.func @transform_8(%arg0: i32) -> (i32, i32) {
    %c0_i32 = arith.constant 0 : i32
    %c0_i32_0 = arith.constant 0 : i32
    return %c0_i32, %arg0 : i32, i32
  }
  func.func @transform_9(%arg0: i32) -> (i32, i32) {
    %c0_i32 = arith.constant 0 : i32
    %c0_i32_0 = arith.constant 0 : i32
    return %c0_i32, %arg0 : i32, i32
  }
  func.func @transform_10(%arg0: i32) -> (i32, i32) {
    %c0_i32 = arith.constant 0 : i32
    %c0_i32_0 = arith.constant 0 : i32
    return %c0_i32, %arg0 : i32, i32
  }
}

</mosaic_0001>

<bundles_post_ra>
// kernel: dti_conv_graph3_layer.3
= control target key start
LH: loop header
LB: loop body
LE: loop exit
PB: predicated region body
PF: predicated region fallthrough
CT: control target
= control target key end

     0   :  { %s468_s12 = smov 0   ;;  %s470_s13 = smov 0   ;;  %s570_s0 = inlined_call_operand.vmem [shape: f32[32,512], index: 0, kind: input, shape index: {}, may-alias: {0,3}]   ;;  %s571_s1 = inlined_call_operand.vmem [shape: f32[32,1], index: 1, kind: input, shape index: {}]   ;;  %s572_s2 = inlined_call_operand.vmem [shape: f32[32,1], index: 2, kind: input, shape index: {}]   ;;  %s573_s3 = inlined_call_operand.vmem [shape: f32[32,512], index: 3, kind: output, shape index: {}, may-alias: {0,3}]  }
   0x1   :  { %s472_s14 = smov 0  }
   0x2 LB: > { %s378_s15 = sadd.s32 4294967295, %s445_s14   ;;  %s485_s16 = sadd.s32 1, %s445_s14   ;;  %s445_s14 = sphi %s472_s14, %s577_s14   ;;  %s441_s13 = sphi %s470_s13, %s576_s13   ;;  %s437_s12 = sphi %s468_s12, %s575_s12  }
   0x3   : > { %s17_s17 = ssub.s32 %s445_s14, %s485_s16  ;;  %s20_s18 = sadd.s32 1, %s441_s13 }
   0x4   : > { %p18_p0 = scmp.eq.s32.totalorder %s17_s17, 0  ;;  %p27_p1 = scmp.ne.s32.totalorder %s441_s13, %s437_s12 }
   0x5   : > { %p28_p2 = scmp.eq.s32.totalorder %s445_s14, 0  ;;  %p99_p3 = scmp.eq.s32.totalorder %s378_s15, 1 }
   0x6   : > { %s496_s19 = scalar_select %p18_p0, %s441_s13, %s20_s18  }
   0x7   : > { %p29_p4 = por %p28_p2, %p27_p1  ;;  %p498_p5 = por %p99_p3, %p27_p1 }
   0x8   : > { %p381_p6 = scmp.ge.s32.totalorder %s445_s14, 2 }
   0xa   : > { %127 = sbr.rel (%p381_p6) target bundleno = 27 (0x1b), region = 24 }
   0xf   : > { %130 = sbr.rel (!%p29_p4) target bundleno = 27 (0x1b), region = 28  ;;  %s132_s21 = sand.u32 (%p29_p4), 1, %s441_s13  }
  0x10   : > { %s393_s22 = sshll.u32 (%p29_p4), %s445_s14, 4  ;;  %s382_s23 = sshll.u32 (%p29_p4), %s132_s21, 6 }
  0x11   : > { %s137_s26 = scalar_lea.vmem (%p29_p4), %s570_s0, %s393_s22  ;;  %s134_s27 = scalar_lea.vmem (%p29_p4), [#allocation2], %s382_s23 }
  0x12   : > { %v150_v0 = vld [vmem:[%s137_s26] sm:$0xff] (%p29_p4)  ;;  %v152_v1 = vld [vmem:[%s137_s26 + $0x8] sm:$0xff] (%p29_p4) }
  0x13   : > { %v154_v2 = vld [vmem:[%s137_s26 + $0x20] sm:$0xff] (%p29_p4)  ;;  %151 = vst [vmem:[%s134_s27] sm:$0xff] (%p29_p4), %v150_v0  ;;  %v156_v3 = vld [vmem:[%s137_s26 + $0x28] sm:$0xff] (%p29_p4) }
  0x14   : > { %153 = vst [vmem:[%s134_s27 + $0x8] sm:$0xff] %v152_v1  ;;  %v158_v4 = vld [vmem:[%s137_s26 + $0x40] sm:$0xff]  ;;  %v160_v5 = vld [vmem:[%s137_s26 + $0x48] sm:$0xff] }
  0x15   : > { %155 = vst [vmem:[%s134_s27 + $0x10] sm:$0xff] %v154_v2  ;;  %v162_v6 = vld [vmem:[%s137_s26 + $0x60] sm:$0xff]  ;;  %v164_v7 = vld [vmem:[%s137_s26 + $0x68] sm:$0xff] }
  0x16   : > { %157 = vst [vmem:[%s134_s27 + $0x18] sm:$0xff] %v156_v3 }
  0x17   : > { %159 = vst [vmem:[%s134_s27 + $0x20] sm:$0xff] %v158_v4 }
  0x18   : > { %161 = vst [vmem:[%s134_s27 + $0x28] sm:$0xff] %v160_v5 }
  0x19   : > { %163 = vst [vmem:[%s134_s27 + $0x30] sm:$0xff] %v162_v6 }
  0x1a   : > { %165 = vst [vmem:[%s134_s27 + $0x38] sm:$0xff] %v164_v7 }
  0x1b PF: > { %p385_p7 = scmp.ge.s32.totalorder %s445_s14, 1  ;;  %p170_p8 = scmp.lt.s32.totalorder %s445_s14, 3 }
  0x1d   : > { %p171_p9 = pnand %p385_p7, %p170_p8 }
  0x1e   : > { %s177_s24 = sand.u32 (!%p171_p9), 1, %s437_s12  }
  0x1f   : > { %174 = sbr.rel (%p171_p9) target bundleno = 183 (0xb7), region = 51  ;;  %s386_s25 = sshll.u32 (!%p171_p9), %s177_s24, 6 }
  0x20   : > { %s179_s26 = scalar_lea.vmem (!%p171_p9), [#allocation2], %s386_s25  ;;  %s535_s27 = scalar_lea.vmem (!%p171_p9), [#allocation3], %s386_s25 }
  0x24   : > { %v211_v8 = vld [vmem:[%s571_s1 + $0x10] sm:$0xff]  ;;  %v209_v9 = vld [vmem:[%s571_s1] sm:$0xff]  ;;  %v447_v10 = vmov 0   ;;  %v212_v12 = vld [vmem:[%s571_s1 + $0x18] sm:$0xff]  ;;  %s394_s12 = sshll.u32 (%p498_p5), %s378_s15, 4 }
  0x25   : > { %421 = vset.pattern.permute.xlu1 %v447_v10  ;;  %420 = vset.pattern.permute.xlu0 %v447_v10  ;;  %v241_v11 = vld [vmem:[%s572_s2] sm:$0xff]  ;;  %v210_v13 = vld [vmem:[%s571_s1 + $0x8] sm:$0xff]  ;;  %v244_v15 = vld [vmem:[%s572_s2 + $0x18] sm:$0xff]  ;;  %s290_s30 = scalar_lea.vmem (%p498_p5), %s573_s3, %s394_s12 }
  0x26   : > { %225 = vperm.xlu1 %421, %v211_v8   ;;  %215 = vperm.xlu0 %420, %v209_v9   ;;  %v242_v14 = vld [vmem:[%s572_s2 + $0x8] sm:$0xff]  ;;  %v243_v16 = vld [vmem:[%s572_s2 + $0x10] sm:$0xff]  ;;  %v201_v17 = vld [vmem:[%s179_s26] sm:$0xff] }
  0x27   : > { %422 = vset.pattern.permute.xlu2 %v447_v10  ;;  %v202_v18 = vld [vmem:[%s179_s26 + $0x8] sm:$0xff]  ;;  %v203_v26 = vld [vmem:[%s179_s26 + $0x10] sm:$0xff]  ;;  %v204_v27 = vld [vmem:[%s179_s26 + $0x18] sm:$0xff] }
  0x28   : > { %247 = vperm.xlu2 %422, %v241_v11   ;;  %v205_v35 = vld [vmem:[%s179_s26 + $0x20] sm:$0xff]  ;;  %v207_v36 = vld [vmem:[%s179_s26 + $0x30] sm:$0xff]  ;;  %v208_v37 = vld [vmem:[%s179_s26 + $0x38] sm:$0xff] }
  0x29   : > { %v206_v38 = vld [vmem:[%s179_s26 + $0x28] sm:$0xff] }
  0x2e   : > { %230 = vperm.xlu1 %421, %v212_v12   ;;  %220 = vperm.xlu0 %420, %v210_v13  }
  0x30   : > { %252 = vperm.xlu2 %422, %v242_v14  }
  0x36   : > { %262 = vperm.xlu1 %421, %v244_v15   ;;  %257 = vperm.xlu0 %420, %v243_v16  }
  0x82   : > { %v248_v19 = vpop.permute.xlu2 %247 }
  0x8a   : > { %v253_v32 = vpop.permute.xlu2 %252 }
  0x98   : > { %v226_v20 = vpop.permute.xlu1 %225  ;;  %v216_v21 = vpop.permute.xlu0 %215 }
  0x99   : > { %v233_v22 = vmul.f32 %v216_v21, %v201_v17  ;;  %v234_v23 = vmul.f32 %v216_v21, %v202_v18  ;;  %v237_v39 = vmul.f32 %v226_v20, %v205_v35  ;;  %v238_v42 = vmul.f32 %v226_v20, %v206_v38 }
  0x9b   : > { %v265_v24 = vadd.f32 %v248_v19, %v233_v22  ;;  %v266_v25 = vadd.f32 %v248_v19, %v234_v23 }
  0x9d   : > { %273 = vst [vmem:[%s535_s27] sm:$0xff] %v265_v24 }
  0x9e   : > { %274 = vst [vmem:[%s535_s27 + $0x8] sm:$0xff] %v266_v25 }
  0xa0   : > { %v231_v28 = vpop.permute.xlu1 %230  ;;  %v221_v29 = vpop.permute.xlu0 %220 }
  0xa1   : > { %v235_v30 = vmul.f32 %v221_v29, %v203_v26  ;;  %v236_v31 = vmul.f32 %v221_v29, %v204_v27  ;;  %v239_v40 = vmul.f32 %v231_v28, %v207_v36  ;;  %v240_v41 = vmul.f32 %v231_v28, %v208_v37 }
  0xa3   : > { %v267_v33 = vadd.f32 %v253_v32, %v235_v30  ;;  %v268_v34 = vadd.f32 %v253_v32, %v236_v31 }
  0xa4   : > { %v303_v49 = vld [vmem:[%s535_s27] sm:$0xff] (%p498_p5) }
  0xa5   : > { %275 = vst [vmem:[%s535_s27 + $0x10] sm:$0xff] %v267_v33  ;;  %v305_v50 = vld [vmem:[%s535_s27 + $0x8] sm:$0xff] (%p498_p5) }
  0xa6   : > { %276 = vst [vmem:[%s535_s27 + $0x18] sm:$0xff] %v268_v34 }
  0xa7   : > { %304 = vst [vmem:[%s290_s30] sm:$0xff] (%p498_p5), %v303_v49 }
  0xa8   : > { %v263_v43 = vpop.permute.xlu1 %262  ;;  %v258_v44 = vpop.permute.xlu0 %257  ;;  %306 = vst [vmem:[%s290_s30 + $0x8] sm:$0xff] (%p498_p5), %v305_v50 }
  0xa9   : > { %v271_v45 = vadd.f32 %v263_v43, %v239_v40  ;;  %v272_v46 = vadd.f32 %v263_v43, %v240_v41  ;;  %v269_v47 = vadd.f32 %v258_v44, %v237_v39  ;;  %v270_v48 = vadd.f32 %v258_v44, %v238_v42 }
  0xaa   : > { %287 = sbr.rel (!%p498_p5) target bundleno = 183 (0xb7), region = 59 }
  0xab   : > { %279 = vst [vmem:[%s535_s27 + $0x30] sm:$0xff] %v271_v45 }
  0xac   : > { %280 = vst [vmem:[%s535_s27 + $0x38] sm:$0xff] %v272_v46  ;;  %v307_v51 = vld [vmem:[%s535_s27 + $0x10] sm:$0xff] (%p498_p5) }
  0xad   : > { %277 = vst [vmem:[%s535_s27 + $0x20] sm:$0xff] %v269_v47  ;;  %v309_v52 = vld [vmem:[%s535_s27 + $0x18] sm:$0xff] (%p498_p5) }
  0xae   : > { %278 = vst [vmem:[%s535_s27 + $0x28] sm:$0xff] %v270_v48 }
  0xaf   : > { %308 = vst [vmem:[%s290_s30 + $0x20] sm:$0xff] %v307_v51 }
  0xb0   : > { %310 = vst [vmem:[%s290_s30 + $0x28] sm:$0xff] %v309_v52 }
  0xb2   : > { %v315_v55 = vld [vmem:[%s535_s27 + $0x30] sm:$0xff] }
  0xb3   : > { %v317_v56 = vld [vmem:[%s535_s27 + $0x38] sm:$0xff]  ;;  %316 = vst [vmem:[%s290_s30 + $0x60] sm:$0xff] %v315_v55 }
  0xb4   : > { %v311_v53 = vld [vmem:[%s535_s27 + $0x20] sm:$0xff]  ;;  %318 = vst [vmem:[%s290_s30 + $0x68] sm:$0xff] %v317_v56 }
  0xb5   : > { %v313_v54 = vld [vmem:[%s535_s27 + $0x28] sm:$0xff]  ;;  %312 = vst [vmem:[%s290_s30 + $0x40] sm:$0xff] %v311_v53 }
  0xb6   : > { %314 = vst [vmem:[%s290_s30 + $0x48] sm:$0xff] %v313_v54 }
  0xb7 PF: > { %p10_p10 = scmp.ge.s32.totalorder %s485_s16, 4   ;;  %s575_s12 = smov %s441_s13 }
  0xb8   : > { %s576_s13 = smov %s496_s19  ;;  %s577_s14 = smov %s485_s16 }
  0xb9   :  { %12 = sbr.rel (!%p10_p10) target bundleno = 2 (0x2), region = 113 }

// kernel: dti_conv_graph3_layer.2
= control target key start
LH: loop header
LB: loop body
LE: loop exit
PB: predicated region body
PF: predicated region fallthrough
CT: control target
= control target key end

     0   :  { %s1339_s13 = smov 0   ;;  %s1341_s14 = smov 0   ;;  %s1590_s0 = inlined_call_operand.vmem [shape: f32[24,512], index: 0, kind: input, shape index: {}]   ;;  %s1591_s1 = inlined_call_operand.vmem [shape: f32[32,512], index: 1, kind: input, shape index: {}]   ;;  %s1592_s2 = inlined_call_operand.vmem [shape: f32[32,24], index: 2, kind: input, shape index: {}]   ;;  %s1593_s3 = inlined_call_operand.vmem [shape: f32[32,1], index: 3, kind: input, shape index: {}]   ;;  %s1594_s4 = inlined_call_operand.vmem [shape: f32[32,32], index: 4, kind: input, shape index: {}]   ;;  %s1595_s5 = inlined_call_operand.vmem [shape: f32[32,1], index: 5, kind: input, shape index: {}]   ;;  %s1596_s6 = inlined_call_operand.vmem [shape: f32[32,32], index: 6, kind: input, shape index: {}]   ;;  %s1597_s7 = inlined_call_operand.vmem [shape: f32[32,1], index: 7, kind: input, shape index: {}]   ;;  %s1598_s8 = inlined_call_operand.vmem [shape: f32[32,512], index: 8, kind: output, shape index: {0}]   ;;  %s1599_s9 = inlined_call_operand.vmem [shape: f32[32,256], index: 9, kind: output, shape index: {1}]   ;;  %s1600_s10 = inlined_call_operand.vmem [shape: f32[32,256], index: 10, kind: output, shape index: {2}]  }
   0x1   :  { %s1343_s15 = smov 0  }
   0x2 LB: > { %s1355_s16 = sadd.s32 4294967295, %s1281_s15   ;;  %s1358_s17 = sadd.s32 1, %s1281_s15   ;;  %s1281_s15 = sphi %s1343_s15, %s1605_s15   ;;  %s1277_s14 = sphi %s1341_s14, %s1604_s14   ;;  %s1273_s13 = sphi %s1339_s13, %s1603_s13  }
   0x3   : > { %s25_s18 = ssub.s32 %s1281_s15, %s1358_s17  ;;  %s28_s19 = sadd.s32 1, %s1277_s14 }
   0x4   : > { %p26_p0 = scmp.eq.s32.totalorder %s25_s18, 0  ;;  %p35_p1 = scmp.ne.s32.totalorder %s1277_s14, %s1273_s13 }
   0x5   : > { %p36_p2 = scmp.eq.s32.totalorder %s1281_s15, 0  ;;  %p217_p3 = scmp.eq.s32.totalorder %s1355_s16, 1 }
   0x6   : > { %s1368_s20 = scalar_select %p26_p0, %s1277_s14, %s28_s19  }
   0x7   : > { %p1370_p4 = por %p36_p2, %p35_p1  ;;  %p1374_p5 = por %p217_p3, %p35_p1 }
   0x8   : > { %p1175_p6 = scmp.ge.s32.totalorder %s1281_s15, 2 }
   0xa   : > { %309 = sbr.rel (%p1175_p6) target bundleno = 37 (0x25), region = 40 }
   0xf   : > { %312 = sbr.rel (!%p1370_p4) target bundleno = 25 (0x19), region = 44  ;;  %s314_s23 = sand.u32 (%p1370_p4), 1, %s1277_s14  }
  0x10   : > { %s1220_s24 = sshll.u32 (%p1370_p4), %s1281_s15, 4  ;;  %s1229_s25 = smul.u32 (%p1370_p4), 48, %s314_s23 }
  0x11   : > { %s319_s28 = scalar_lea.vmem (%p1370_p4), %s1590_s0, %s1220_s24 }
  0x12   : > { %v332_v0 = vld [vmem:[%s319_s28] sm:$0xff] (%p1370_p4)  ;;  %v334_v1 = vld [vmem:[%s319_s28 + $0x8] sm:$0xff] (%p1370_p4)  ;;  %s316_s29 = scalar_lea.vmem (%p1370_p4), [#allocation2], %s1229_s25 }
  0x13   : > { %v336_v2 = vld [vmem:[%s319_s28 + $0x20] sm:$0xff] (%p1370_p4)  ;;  %333 = vst [vmem:[%s316_s29] sm:$0xff] (%p1370_p4), %v332_v0  ;;  %v338_v3 = vld [vmem:[%s319_s28 + $0x28] sm:$0xff] (%p1370_p4) }
  0x14   : > { %335 = vst [vmem:[%s316_s29 + $0x8] sm:$0xff] %v334_v1  ;;  %v340_v4 = vld [vmem:[%s319_s28 + $0x40] sm:$0xff]  ;;  %v342_v5 = vld [vmem:[%s319_s28 + $0x48] sm:$0xff] }
  0x15   : > { %337 = vst [vmem:[%s316_s29 + $0x10] sm:$0xff] %v336_v2 }
  0x16   : > { %339 = vst [vmem:[%s316_s29 + $0x18] sm:$0xff] %v338_v3 }
  0x17   : > { %341 = vst [vmem:[%s316_s29 + $0x20] sm:$0xff] %v340_v4 }
  0x18   : > { %343 = vst [vmem:[%s316_s29 + $0x28] sm:$0xff] %v342_v5 }
  0x19 PF: > { %349 = sbr.rel (!%p1370_p4) target bundleno = 37 (0x25), region = 67  ;;  %s351_s30 = sand.u32 (%p1370_p4), 1, %s1277_s14  }
  0x1a   : > { %s1221_s11 = sshll.u32 (%p1370_p4), %s1281_s15, 4  ;;  %s1178_s12 = sshll.u32 (%p1370_p4), %s351_s30, 6 }
  0x1b   : > { %s356_s23 = scalar_lea.vmem (%p1370_p4), %s1591_s1, %s1221_s11  ;;  %s353_s24 = scalar_lea.vmem (%p1370_p4), [#allocation3], %s1178_s12 }
  0x1c   : > { %v369_v6 = vld [vmem:[%s356_s23] sm:$0xff] (%p1370_p4)  ;;  %v371_v7 = vld [vmem:[%s356_s23 + $0x8] sm:$0xff] (%p1370_p4) }
  0x1d   : > { %v373_v8 = vld [vmem:[%s356_s23 + $0x20] sm:$0xff] (%p1370_p4)  ;;  %370 = vst [vmem:[%s353_s24] sm:$0xff] (%p1370_p4), %v369_v6  ;;  %v375_v9 = vld [vmem:[%s356_s23 + $0x28] sm:$0xff] (%p1370_p4) }
  0x1e   : > { %372 = vst [vmem:[%s353_s24 + $0x8] sm:$0xff] %v371_v7  ;;  %v377_v10 = vld [vmem:[%s356_s23 + $0x40] sm:$0xff]  ;;  %v379_v11 = vld [vmem:[%s356_s23 + $0x48] sm:$0xff] }
  0x1f   : > { %374 = vst [vmem:[%s353_s24 + $0x10] sm:$0xff] %v373_v8  ;;  %v381_v12 = vld [vmem:[%s356_s23 + $0x60] sm:$0xff]  ;;  %v383_v13 = vld [vmem:[%s356_s23 + $0x68] sm:$0xff] }
  0x20   : > { %376 = vst [vmem:[%s353_s24 + $0x18] sm:$0xff] %v375_v9 }
  0x21   : > { %378 = vst [vmem:[%s353_s24 + $0x20] sm:$0xff] %v377_v10 }
  0x22   : > { %380 = vst [vmem:[%s353_s24 + $0x28] sm:$0xff] %v379_v11 }
  0x23   : > { %382 = vst [vmem:[%s353_s24 + $0x30] sm:$0xff] %v381_v12 }
  0x24   : > { %384 = vst [vmem:[%s353_s24 + $0x38] sm:$0xff] %v383_v13 }
  0x25 PF: > { %p1181_p7 = scmp.ge.s32.totalorder %s1281_s15, 1  ;;  %p389_p8 = scmp.lt.s32.totalorder %s1281_s15, 3 }
  0x27   : > { %p390_p9 = pnand %p1181_p7, %p389_p8 }
  0x28   : > { %s1396_s21 = sand.u32 (!%p390_p9), 1, %s1273_s13   ;;  %s1210_s19 = sshll.u32 (!%p390_p9), %s1355_s16, 8 }
  0x29   : > { %393 = sbr.rel (%p390_p9) target bundleno = 553 (0x229), region = 90  ;;  %s1182_s23 = sshll.u32 (!%p390_p9), %s1396_s21, 6 }
  0x2a   : > { %s1230_s29 = smul.u32 (!%p390_p9), 48, %s1396_s21  ;;  %s405_s24 = scalar_lea.vmem (!%p390_p9), [#allocation3], %s1182_s23 }
  0x2b   : > { %s1508_s25 = scalar_lea.vmem (!%p390_p9), [#allocation4], %s1182_s23 }
  0x2c   : > { %s398_s15 = scalar_lea.vmem (!%p390_p9), [#allocation2], %s1230_s29 }
  0x2e   : > { %v546_v14 = vld [vmem:[%s1593_s3 + $0x18] sm:$0xff]  ;;  %v544_v15 = vld [vmem:[%s1593_s3 + $0x8] sm:$0xff]  ;;  %v1283_v16 = vmov 0   ;;  %v462_v17 = vld [vmem:[%s398_s15 + $0x20] sm:$0xff]  ;;  %vm472_vm0 = vcmask 195584   ;;  %vm627_vm9 = vcmask 261120  }
  0x2f   : > { %1256 = vset.pattern.permute.xlu0 %v1283_v16  ;;  %1257 = vset.pattern.permute.xlu1 %v1283_v16  ;;  %v463_v18 = vld [vmem:[%s398_s15 + $0x28] sm:$0xff]  ;;  %v460_v19 = vld [vmem:[%s398_s15 + $0x10] sm:$0xff]  ;;  %v461_v20 = vld [vmem:[%s398_s15 + $0x18] sm:$0xff]  ;;  %s1222_s26 = sshll.u32 (%p1374_p5), %s1355_s16, 4 }
  0x30   : > { %564 = vperm.xlu0 %1256, %v546_v14   ;;  %554 = vperm.xlu1 %1257, %v544_v15   ;;  %v458_v21 = vld [vmem:[%s398_s15] sm:$0xff]  ;;  %v459_v22 = vld [vmem:[%s398_s15 + $0x8] sm:$0xff]  ;;  %s910_s29 = scalar_lea.vmem (%p1374_p5), %s1598_s8, %s1222_s26 }
  0x31   : > { %1258 = vset.pattern.permute.xlu2 %v1283_v16  ;;  %1223 = vmatpush.msra.mxu2 %v462_v17  ;;  %v456_v23 = vld [vmem:[%s1592_s2 + $0x10] sm:$0xff]  ;;  %v454_v24 = vld [vmem:[%s1592_s2] sm:$0xff]  ;;  %v457_v27 = vld [vmem:[%s1592_s2 + $0x18] sm:$0xff] }
  0x32   : > { %1226 = vmatpush.msra.mxu3 %v463_v18  ;;  %498 = vmatpush.msra.mxu0 %v462_v17  ;;  %v545_v25 = vld [vmem:[%s1593_s3 + $0x10] sm:$0xff]  ;;  %v543_v26 = vld [vmem:[%s1593_s3] sm:$0xff]  ;;  %v455_v28 = vld [vmem:[%s1592_s2 + $0x8] sm:$0xff] }
  0x33   : > { %527 = vmatpush.msra.mxu1 %v463_v18  ;;  %1224 = vmatpush.msra.mxu2 %v460_v19  ;;  %v604_v29 = vld [vmem:[%s1595_s5 + $0x8] sm:$0xff]  ;;  %v603_v30 = vld [vmem:[%s1595_s5] sm:$0xff]  ;;  %v728_v32 = vld [vmem:[%s1597_s7 + $0x10] sm:$0xff] }
  0x34   : > { %1227 = vmatpush.msra.mxu3 %v461_v20  ;;  %499 = vmatpush.msra.mxu0 %v460_v19  ;;  %v727_v31 = vld [vmem:[%s1597_s7 + $0x8] sm:$0xff]  ;;  %v468_v39 = vld [vmem:[%s405_s24 + $0x20] sm:$0xff]  ;;  %v466_v43 = vld [vmem:[%s405_s24 + $0x10] sm:$0xff] }
  0x35   : > { %528 = vmatpush.msra.mxu1 %v461_v20  ;;  %1225 = vmatpush.msra.mxu2 %v458_v21  ;;  %v469_v40 = vld [vmem:[%s405_s24 + $0x28] sm:$0xff]  ;;  %v467_v45 = vld [vmem:[%s405_s24 + $0x18] sm:$0xff]  ;;  %v464_v47 = vld [vmem:[%s405_s24] sm:$0xff] }
  0x36   : > { %1228 = vmatpush.msra.mxu3 %v459_v22  ;;  %1188 = vmatmul.msk.f32.vlgmr.msra.gmra.mxu2 %vm472_vm0, %v456_v23  ;;  %v465_v48 = vld [vmem:[%s405_s24 + $0x8] sm:$0xff]  ;;  %v470_v49 = vld [vmem:[%s405_s24 + $0x30] sm:$0xff]  ;;  %v471_v50 = vld [vmem:[%s405_s24 + $0x38] sm:$0xff]  ;;  %s1184_s24 = sshll.u32 %s1396_s21, 5 }
  0x37   : > { %1192 = vmatmul.msk.f32.vlgmr.msra.gmra.mxu3 %vm472_vm0, %v456_v23  ;;  %500 = vmatpush.msra.mxu0 %v458_v21  ;;  %v606_v13 = vld [vmem:[%s1595_s5 + $0x18] sm:$0xff]  ;;  %v599_v20 = vld [vmem:[%s1594_s4] sm:$0xff]  ;;  %v605_v23 = vld [vmem:[%s1595_s5 + $0x10] sm:$0xff]  ;;  %s1516_s21 = scalar_lea.vmem [#allocation5], %s1184_s24  ;;  %s1519_s23 = scalar_lea.vmem [#allocation6], %s1184_s24 }
  0x38   : > { %529 = vmatpush.msra.mxu1 %v459_v22  ;;  %1186 = vmatmul.msk.f32.vlgmr.msra.gmra.mxu0 %vm472_vm0, %v454_v24 }
  0x39   : > { %1190 = vmatmul.msk.f32.vlgmr.msra.gmra.mxu1 %vm472_vm0, %v454_v24  ;;  %559 = vperm.xlu0 %1256, %v545_v25   ;;  %v600_v24 = vld [vmem:[%s1594_s4 + $0x8] sm:$0xff]  ;;  %v726_v25 = vld [vmem:[%s1597_s7] sm:$0xff] }
  0x3a   : > { %549 = vperm.xlu1 %1257, %v543_v26   ;;  %624 = vperm.xlu2 %1258, %v606_v13   ;;  %v601_v26 = vld [vmem:[%s1594_s4 + $0x10] sm:$0xff] }
  0x3e   : > { %1189 = vmatmul.msk.f32.gmra.mxu2 %vm472_vm0, %v457_v27 }
  0x3f   : > { %1193 = vmatmul.msk.f32.gmra.mxu3 %vm472_vm0, %v457_v27  ;;  %v729_v27 = vld [vmem:[%s1597_s7 + $0x18] sm:$0xff] }
  0x40   : > { %1187 = vmatmul.msk.f32.gmra.mxu0 %vm472_vm0, %v455_v28 }
  0x41   : > { %1191 = vmatmul.msk.f32.gmra.mxu1 %vm472_vm0, %v455_v28  ;;  %614 = vperm.xlu0 %1256, %v604_v29   ;;  %v602_v28 = vld [vmem:[%s1594_s4 + $0x18] sm:$0xff] }
  0x42   : > { %609 = vperm.xlu1 %1257, %v603_v30   ;;  %619 = vperm.xlu2 %1258, %v605_v23  }
  0x49   : > { %737 = vperm.xlu0 %1256, %v727_v31  }
  0x4a   : > { %742 = vperm.xlu1 %1257, %v728_v32   ;;  %732 = vperm.xlu2 %1258, %v726_v25  }
  0x52   : > { %747 = vperm.xlu2 %1258, %v729_v27  }
  0xa2   : > { %v565_v35 = vpop.permute.xlu0 %564  ;;  %v555_v38 = vpop.permute.xlu1 %554 }
  0xab   : > { %v560_v51 = vpop.permute.xlu0 %559 }
  0xac   : > { %v550_v62 = vpop.permute.xlu1 %549 }
  0xb5   : > { %v502_v33 = vpop.f32.mrf.mxu0 }
  0xb6   : > { %v531_v34 = vpop.f32.mrf.mxu1  ;;  %v503_v54 = vadd.f32 %v502_v33, %v464_v47  ;;  %v625_v33 = vpop.permute.xlu2 %624 }
  0xb7   : > { %v532_v55 = vadd.f32 %v531_v34, %v465_v48 }
  0xb8   : > { %v567_v3 = vadd.f32 %v550_v62, %v503_v54 }
  0xb9   : > { %v508_v36 = vpop.f32.mrf.mxu2  ;;  %v568_v4 = vadd.f32 %v550_v62, %v532_v55 }
  0xba   : > { %v537_v37 = vpop.f32.mrf.mxu3  ;;  %v509_v41 = vadd.f32 %v508_v36, %v468_v39  ;;  %v583_v16 = vmul.f32 0.01, %v567_v3  ;;  %vm575_vm7 = vcmp.gt.f32.partialorder %v567_v3, 0.0  ;;  %v615_v39 = vpop.permute.xlu0 %614 }
  0xbb   : > { %v538_v42 = vadd.f32 %v537_v37, %v469_v40  ;;  %v584_v17 = vmul.f32 0.01, %v568_v4  ;;  %vm576_vm8 = vcmp.gt.f32.partialorder %v568_v4, 0.0 }
  0xbc   : > { %v571_v56 = vadd.f32 %v560_v51, %v509_v41  ;;  %v591_v21 = vsel %vm575_vm7, %v567_v3, %v583_v16  ;;  %v724_v3 = vld [vmem:[%s1596_s6 + $0x10] sm:$0xff] }
  0xbd   : > { %v505_v44 = vpop.f32.mrf.mxu0  ;;  %v572_v57 = vadd.f32 %v560_v51, %v538_v42  ;;  %v592_v22 = vsel %vm576_vm8, %v568_v4, %v584_v17  ;;  %v610_v42 = vpop.permute.xlu1 %609  ;;  %v725_v4 = vld [vmem:[%s1596_s6 + $0x18] sm:$0xff] }
  0xbe   : > { %v534_v46 = vpop.f32.mrf.mxu1  ;;  %v506_v52 = vadd.f32 %v505_v44, %v466_v43  ;;  %v587_v5 = vmul.f32 0.01, %v571_v56  ;;  %vm579_vm3 = vcmp.gt.f32.partialorder %v571_v56, 0.0  ;;  %v620_v36 = vpop.permute.xlu2 %619 }
  0xbf   : > { %v535_v53 = vadd.f32 %v534_v46, %v467_v45  ;;  %v588_v6 = vmul.f32 0.01, %v572_v57  ;;  %vm580_vm4 = vcmp.gt.f32.partialorder %v572_v57, 0.0 }
  0xc0   : > { %v569_v63 = vadd.f32 %v555_v38, %v506_v52  ;;  %v595_v14 = vsel %vm579_vm3, %v571_v56, %v587_v5  ;;  %v853_v5 = vlaneseq }
  0xc1   : > { %v511_v58 = vpop.f32.mrf.mxu2  ;;  %v570_v0 = vadd.f32 %v555_v38, %v535_v53  ;;  %v596_v15 = vsel %vm580_vm4, %v572_v57, %v588_v6 }
  0xc2   : > { %v540_v59 = vpop.f32.mrf.mxu3  ;;  %v512_v60 = vadd.f32 %v511_v58, %v470_v49  ;;  %v585_v11 = vmul.f32 0.01, %v569_v63  ;;  %vm577_vm5 = vcmp.gt.f32.partialorder %v569_v63, 0.0  ;;  %v854_v6 = vand.u32 127, %v853_v5 }
  0xc3   : > { %v541_v61 = vadd.f32 %v540_v59, %v471_v50  ;;  %v586_v12 = vmul.f32 0.01, %v570_v0  ;;  %vm578_vm6 = vcmp.gt.f32.partialorder %v570_v0, 0.0 }
  0xc4   : > { %v573_v1 = vadd.f32 %v565_v35, %v512_v60  ;;  %v593_v18 = vsel %vm577_vm5, %v569_v63, %v585_v11  ;;  %v722_v63 = vld [vmem:[%s1596_s6] sm:$0xff] }
  0xc5   : > { %v574_v2 = vadd.f32 %v565_v35, %v541_v61  ;;  %v594_v19 = vsel %vm578_vm6, %v570_v0, %v586_v12 }
  0xc6   : > { %vm581_vm1 = vcmp.gt.f32.partialorder %v573_v1, 0.0  ;;  %v589_v7 = vmul.f32 0.01, %v573_v1  ;;  %v733_v11 = vpop.permute.xlu2 %732 }
  0xc7   : > { %vm582_vm2 = vcmp.gt.f32.partialorder %v574_v2, 0.0  ;;  %v590_v8 = vmul.f32 0.01, %v574_v2 }
  0xc8   : > { %v597_v9 = vsel %vm581_vm1, %v573_v1, %v589_v7  ;;  %v855_v7 = vadd.s32 128, %v854_v6 }
  0xc9   : > { %v598_v10 = vsel %vm582_vm2, %v574_v2, %v590_v8  ;;  %652 = vmatpush.msrb.mxu2 %v597_v9  ;;  %v723_v2 = vld [vmem:[%s1596_s6 + $0x8] sm:$0xff]  ;;  %v856_v8 = vstv %s1210_s19 }
  0xca   : > { %681 = vmatpush.msrb.mxu3 %v598_v10  ;;  %v1499_v9 = vadd.s32 %v856_v8, %v854_v6  ;;  %v1501_v10 = vadd.s32 %v856_v8, %v855_v7 }
  0xcb   : > { %653 = vmatpush.msrb.mxu2 %v595_v14 }
  0xcc   : > { %682 = vmatpush.msrb.mxu3 %v596_v15  ;;  %vm859_vm2 = vcmp.lt.s32.totalorder %v1499_v9, 300  ;;  %vm860_vm3 = vcmp.lt.s32.totalorder %v1501_v10, 300 }
  0xcd   : > { %654 = vmatpush.msrb.mxu2 %v593_v18 }
  0xce   : > { %683 = vmatpush.msrb.mxu3 %v594_v19 }
  0xcf   : > { %655 = vmatpush.msrb.mxu2 %v591_v21 }
  0xd0   : > { %684 = vmatpush.msrb.mxu3 %v592_v22  ;;  %1194 = vmatmul.msk.f32.vlgmr.msrb.gmra.mxu2 %vm627_vm9, %v599_v20  ;;  %v738_v22 = vpop.permute.xlu0 %737 }
  0xd1   : > { %1198 = vmatmul.msk.f32.vlgmr.msrb.gmra.mxu3 %vm627_vm9, %v599_v20 }
  0xd8   : > { %1195 = vmatmul.msk.f32.gmra.mxu2 %vm627_vm9, %v600_v24 }
  0xd9   : > { %1199 = vmatmul.msk.f32.gmra.mxu3 %vm627_vm9, %v600_v24 }
  0xe0   : > { %1196 = vmatmul.msk.f32.gmra.mxu2 %vm627_vm9, %v601_v26 }
  0xe1   : > { %1200 = vmatmul.msk.f32.gmra.mxu3 %vm627_vm9, %v601_v26 }
  0xe8   : > { %1197 = vmatmul.msk.f32.gmra.mxu2 %vm627_vm9, %v602_v28 }
  0xe9   : > { %1201 = vmatmul.msk.f32.gmra.mxu3 %vm627_vm9, %v602_v28 }
 0x153   : > { %v657_v29 = vpop.f32.mrf.mxu2 }
 0x154   : > { %v686_v30 = vpop.f32.mrf.mxu3  ;;  %v658_v47 = vadd.f32 %v657_v29, %v610_v42 }
 0x155   : > { %v687_v48 = vadd.f32 %v686_v30, %v610_v42 }
 0x156   : > { %v706_v59 = vmul.f32 0.01, %v658_v47  ;;  %vm698_vm0 = vcmp.gt.f32.partialorder %v658_v47, 0.0 }
 0x157   : > { %v707_v60 = vmul.f32 0.01, %v687_v48  ;;  %vm699_vm1 = vcmp.gt.f32.partialorder %v687_v48, 0.0 }
 0x158   : > { %v714_v0 = vsel %vm698_vm0, %v658_v47, %v706_v59 }
 0x159   : > { %v715_v1 = vsel %vm699_vm1, %v687_v48, %v707_v60 }
 0x15b   : > { %v660_v31 = vpop.f32.mrf.mxu2 }
 0x15c   : > { %v689_v32 = vpop.f32.mrf.mxu3  ;;  %v661_v43 = vadd.f32 %v660_v31, %v615_v39 }
 0x15d   : > { %v690_v44 = vadd.f32 %v689_v32, %v615_v39 }
 0x15e   : > { %v708_v55 = vmul.f32 0.01, %v661_v43  ;;  %vm700_vm14 = vcmp.gt.f32.partialorder %v661_v43, 0.0 }
 0x15f   : > { %v709_v56 = vmul.f32 0.01, %v690_v44  ;;  %vm701_vm15 = vcmp.gt.f32.partialorder %v690_v44, 0.0 }
 0x160   : > { %v716_v61 = vsel %vm700_vm14, %v661_v43, %v708_v55 }
 0x161   : > { %v717_v62 = vsel %vm701_vm15, %v690_v44, %v709_v56 }
 0x163   : > { %v663_v34 = vpop.f32.mrf.mxu2 }
 0x164   : > { %v692_v35 = vpop.f32.mrf.mxu3  ;;  %v664_v37 = vadd.f32 %v663_v34, %v620_v36 }
 0x165   : > { %v693_v38 = vadd.f32 %v692_v35, %v620_v36 }
 0x166   : > { %v710_v49 = vmul.f32 0.01, %v664_v37  ;;  %vm702_vm12 = vcmp.gt.f32.partialorder %v664_v37, 0.0 }
 0x167   : > { %v711_v50 = vmul.f32 0.01, %v693_v38  ;;  %vm703_vm13 = vcmp.gt.f32.partialorder %v693_v38, 0.0 }
 0x168   : > { %v718_v57 = vsel %vm702_vm12, %v664_v37, %v710_v49  ;;  %v743_v37 = vpop.permute.xlu1 %742 }
 0x169   : > { %v719_v58 = vsel %vm703_vm13, %v693_v38, %v711_v50 }
 0x16b   : > { %v666_v40 = vpop.f32.mrf.mxu2 }
 0x16c   : > { %v695_v41 = vpop.f32.mrf.mxu3  ;;  %v667_v45 = vadd.f32 %v666_v40, %v625_v33 }
 0x16d   : > { %v696_v46 = vadd.f32 %v695_v41, %v625_v33 }
 0x16e   : > { %vm704_vm10 = vcmp.gt.f32.partialorder %v667_v45, 0.0  ;;  %v712_v51 = vmul.f32 0.01, %v667_v45 }
 0x16f   : > { %vm705_vm11 = vcmp.gt.f32.partialorder %v696_v46, 0.0  ;;  %v713_v52 = vmul.f32 0.01, %v696_v46 }
 0x170   : > { %v720_v53 = vsel %vm704_vm10, %v667_v45, %v712_v51  ;;  %v748_v51 = vpop.permute.xlu2 %747 }
 0x171   : > { %v721_v54 = vsel %vm705_vm11, %v696_v46, %v713_v52  ;;  %774 = vmatpush.msrb.mxu0 %v720_v53 }
 0x172   : > { %803 = vmatpush.msrb.mxu1 %v721_v54 }
 0x173   : > { %775 = vmatpush.msrb.mxu0 %v718_v57 }
 0x174   : > { %804 = vmatpush.msrb.mxu1 %v719_v58 }
 0x175   : > { %776 = vmatpush.msrb.mxu0 %v716_v61 }
 0x176   : > { %805 = vmatpush.msrb.mxu1 %v717_v62 }
 0x177   : > { %777 = vmatpush.msrb.mxu0 %v714_v0 }
 0x178   : > { %806 = vmatpush.msrb.mxu1 %v715_v1  ;;  %1202 = vmatmul.msk.f32.vlgmr.msrb.gmra.mxu0 %vm627_vm9, %v722_v63 }
 0x179   : > { %1206 = vmatmul.msk.f32.vlgmr.msrb.gmra.mxu1 %vm627_vm9, %v722_v63 }
 0x180   : > { %1203 = vmatmul.msk.f32.gmra.mxu0 %vm627_vm9, %v723_v2 }
 0x181   : > { %1207 = vmatmul.msk.f32.gmra.mxu1 %vm627_vm9, %v723_v2 }
 0x188   : > { %1204 = vmatmul.msk.f32.gmra.mxu0 %vm627_vm9, %v724_v3 }
 0x189   : > { %1208 = vmatmul.msk.f32.gmra.mxu1 %vm627_vm9, %v724_v3 }
 0x190   : > { %1205 = vmatmul.msk.f32.gmra.mxu0 %vm627_vm9, %v725_v4 }
 0x191   : > { %1209 = vmatmul.msk.f32.gmra.mxu1 %vm627_vm9, %v725_v4 }
 0x1f5   : > { %v779_v12 = vpop.f32.mrf.mxu0 }
 0x1f6   : > { %v808_v13 = vpop.f32.mrf.mxu1  ;;  %v780_v14 = vadd.f32 %v779_v12, %v733_v11 }
 0x1f7   : > { %v809_v15 = vadd.f32 %v808_v13, %v733_v11 }
 0x1f8   : > { %vm820_vm4 = vcmp.gt.f32.partialorder %v780_v14, 0.0  ;;  %v828_v16 = vmul.f32 0.01, %v780_v14 }
 0x1f9   : > { %vm821_vm5 = vcmp.gt.f32.partialorder %v809_v15, 0.0  ;;  %v829_v17 = vmul.f32 0.01, %v809_v15 }
 0x1fa   : > { %v836_v18 = vsel %vm820_vm4, %v780_v14, %v828_v16 }
 0x1fb   : > { %v837_v19 = vsel %vm821_vm5, %v809_v15, %v829_v17  ;;  %844 = vst [vmem:[%s1508_s25] sm:$0xff] %v836_v18  ;;  %v861_v20 = vsel %vm859_vm2, %v836_v18, 0.0 }
 0x1fc   : > { %v862_v21 = vsel %vm860_vm3, %v837_v19, 0.0  ;;  %v869_v23 = vmul.f32 %v861_v20, %v861_v20  ;;  %845 = vst [vmem:[%s1508_s25 + $0x8] sm:$0xff] %v837_v19 }
 0x1fd   : > { %v870_v24 = vmul.f32 %v862_v21, %v862_v21  ;;  %v877_v25 = vadd.f32 %v862_v21, %v861_v20  ;;  %v782_v26 = vpop.f32.mrf.mxu0 }
 0x1fe   : > { %v811_v27 = vpop.f32.mrf.mxu1  ;;  %v783_v29 = vadd.f32 %v782_v26, %v738_v22 }
 0x1ff   : > { %v881_v28 = vadd.f32 %v870_v24, %v869_v23  ;;  %885 = vst [vmem:[%s1516_s21] sm:$0xff] %v877_v25  ;;  %v812_v30 = vadd.f32 %v811_v27, %v738_v22 }
 0x200   : > { %vm822_vm6 = vcmp.gt.f32.partialorder %v783_v29, 0.0  ;;  %v830_v31 = vmul.f32 0.01, %v783_v29 }
 0x201   : > { %889 = vst [vmem:[%s1519_s23] sm:$0xff] %v881_v28  ;;  %vm823_vm7 = vcmp.gt.f32.partialorder %v812_v30, 0.0  ;;  %v831_v32 = vmul.f32 0.01, %v812_v30 }
 0x202   : > { %v838_v33 = vsel %vm822_vm6, %v783_v29, %v830_v31  ;;  %v923_v7 = vld [vmem:[%s1508_s25] sm:$0xff] (%p1374_p5) }
 0x203   : > { %v839_v34 = vsel %vm823_vm7, %v812_v30, %v831_v32  ;;  %846 = vst [vmem:[%s1508_s25 + $0x10] sm:$0xff] %v838_v33  ;;  %v863_v35 = vsel %vm859_vm2, %v838_v33, 0.0  ;;  %v925_v8 = vld [vmem:[%s1508_s25 + $0x8] sm:$0xff] (%p1374_p5) }
 0x204   : > { %v864_v36 = vsel %vm860_vm3, %v839_v34, 0.0  ;;  %v871_v38 = vmul.f32 %v863_v35, %v863_v35  ;;  %847 = vst [vmem:[%s1508_s25 + $0x18] sm:$0xff] %v839_v34 }
 0x205   : > { %v872_v39 = vmul.f32 %v864_v36, %v864_v36  ;;  %v878_v40 = vadd.f32 %v864_v36, %v863_v35  ;;  %v785_v41 = vpop.f32.mrf.mxu0  ;;  %924 = vst [vmem:[%s910_s29] sm:$0xff] (%p1374_p5), %v923_v7 }
 0x206   : > { %v814_v42 = vpop.f32.mrf.mxu1  ;;  %v786_v44 = vadd.f32 %v785_v41, %v743_v37  ;;  %926 = vst [vmem:[%s910_s29 + $0x8] sm:$0xff] (%p1374_p5), %v925_v8 }
 0x207   : > { %v882_v43 = vadd.f32 %v872_v39, %v871_v38  ;;  %886 = vst [vmem:[%s1516_s21 + $0x8] sm:$0xff] %v878_v40  ;;  %v815_v45 = vadd.f32 %v814_v42, %v743_v37 }
 0x208   : > { %vm824_vm8 = vcmp.gt.f32.partialorder %v786_v44, 0.0  ;;  %v832_v46 = vmul.f32 0.01, %v786_v44 }
 0x209   : > { %890 = vst [vmem:[%s1519_s23 + $0x8] sm:$0xff] %v882_v43  ;;  %vm825_vm9 = vcmp.gt.f32.partialorder %v815_v45, 0.0  ;;  %v833_v47 = vmul.f32 0.01, %v815_v45 }
 0x20a   : > { %v840_v48 = vsel %vm824_vm8, %v786_v44, %v832_v46  ;;  %v927_v9 = vld [vmem:[%s1508_s25 + $0x10] sm:$0xff] (%p1374_p5) }
 0x20b   : > { %848 = vst [vmem:[%s1508_s25 + $0x20] sm:$0xff] %v840_v48  ;;  %v865_v49 = vsel %vm859_vm2, %v840_v48, 0.0  ;;  %v841_v50 = vsel %vm825_vm9, %v815_v45, %v833_v47  ;;  %v929_v10 = vld [vmem:[%s1508_s25 + $0x18] sm:$0xff] (%p1374_p5) }
 0x20c   : > { %v873_v52 = vmul.f32 %v865_v49, %v865_v49  ;;  %849 = vst [vmem:[%s1508_s25 + $0x28] sm:$0xff] %v841_v50  ;;  %v866_v53 = vsel %vm860_vm3, %v841_v50, 0.0 }
 0x20d   : > { %v874_v54 = vmul.f32 %v866_v53, %v866_v53  ;;  %v879_v55 = vadd.f32 %v866_v53, %v865_v49  ;;  %v788_v56 = vpop.f32.mrf.mxu0  ;;  %928 = vst [vmem:[%s910_s29 + $0x20] sm:$0xff] (%p1374_p5), %v927_v9 }
 0x20e   : > { %v817_v57 = vpop.f32.mrf.mxu1  ;;  %v789_v58 = vadd.f32 %v788_v56, %v748_v51  ;;  %930 = vst [vmem:[%s910_s29 + $0x28] sm:$0xff] (%p1374_p5), %v929_v10 }
 0x20f   : > { %v818_v59 = vadd.f32 %v817_v57, %v748_v51  ;;  %v883_v60 = vadd.f32 %v874_v54, %v873_v52  ;;  %887 = vst [vmem:[%s1516_s21 + $0x10] sm:$0xff] %v879_v55 }
 0x210   : > { %vm826_vm10 = vcmp.gt.f32.partialorder %v789_v58, 0.0  ;;  %v834_v61 = vmul.f32 0.01, %v789_v58 }
 0x211   : > { %vm827_vm11 = vcmp.gt.f32.partialorder %v818_v59, 0.0  ;;  %v835_v62 = vmul.f32 0.01, %v818_v59  ;;  %891 = vst [vmem:[%s1519_s23 + $0x10] sm:$0xff] %v883_v60 }
 0x212   : > { %v842_v63 = vsel %vm826_vm10, %v789_v58, %v834_v61  ;;  %v931_v11 = vld [vmem:[%s1508_s25 + $0x20] sm:$0xff] (%p1374_p5) }
 0x213   : > { %v843_v0 = vsel %vm827_vm11, %v818_v59, %v835_v62  ;;  %850 = vst [vmem:[%s1508_s25 + $0x30] sm:$0xff] %v842_v63  ;;  %v867_v1 = vsel %vm859_vm2, %v842_v63, 0.0  ;;  %v933_v12 = vld [vmem:[%s1508_s25 + $0x28] sm:$0xff] (%p1374_p5) }
 0x214   : > { %v868_v2 = vsel %vm860_vm3, %v843_v0, 0.0  ;;  %v875_v3 = vmul.f32 %v867_v1, %v867_v1  ;;  %851 = vst [vmem:[%s1508_s25 + $0x38] sm:$0xff] %v843_v0 }
 0x215   : > { %v876_v4 = vmul.f32 %v868_v2, %v868_v2  ;;  %v880_v5 = vadd.f32 %v868_v2, %v867_v1  ;;  %907 = sbr.rel (!%p1374_p5) target bundleno = 541 (0x21d), region = 102  ;;  %932 = vst [vmem:[%s910_s29 + $0x40] sm:$0xff] (%p1374_p5), %v931_v11 }
 0x216   : > { %934 = vst [vmem:[%s910_s29 + $0x48] sm:$0xff] (%p1374_p5), %v933_v12 }
 0x217   : > { %v884_v6 = vadd.f32 %v876_v4, %v875_v3  ;;  %888 = vst [vmem:[%s1516_s21 + $0x18] sm:$0xff] %v880_v5 }
 0x219   : > { %892 = vst [vmem:[%s1519_s23 + $0x18] sm:$0xff] %v884_v6 }
 0x21a   : > { %v935_v13 = vld [vmem:[%s1508_s25 + $0x30] sm:$0xff] }
 0x21b   : > { %v937_v14 = vld [vmem:[%s1508_s25 + $0x38] sm:$0xff]  ;;  %936 = vst [vmem:[%s910_s29 + $0x60] sm:$0xff] %v935_v13 }
 0x21c   : > { %938 = vst [vmem:[%s910_s29 + $0x68] sm:$0xff] %v937_v14 }
 0x21d PF: > { %944 = sbr.rel (!%p1374_p5) target bundleno = 547 (0x223), region = 125  ;;  %s1216_s15 = sshll.u32 (%p1374_p5), %s1355_s16, 3  ;;  %v981_v15 = vld [vmem:[%s1516_s21] sm:$0xff] (%p1374_p5)  ;;  %v983_v16 = vld [vmem:[%s1516_s21 + $0x8] sm:$0xff] (%p1374_p5)  ;;  %v985_v17 = vld [vmem:[%s1516_s21 + $0x10] sm:$0xff] (%p1374_p5) }
 0x21e   : > { %s946_s11 = scalar_lea.vmem (%p1374_p5), %s1599_s9, %s1216_s15 }
 0x21f   : > { %982 = vst [vmem:[%s946_s11] sm:$0xff] (%p1374_p5), %v981_v15 }
 0x220   : > { %984 = vst [vmem:[%s946_s11 + $0x10] sm:$0xff] (%p1374_p5), %v983_v16 }
 0x221   : > { %v987_v18 = vld [vmem:[%s1516_s21 + $0x18] sm:$0xff] (%p1374_p5)  ;;  %986 = vst [vmem:[%s946_s11 + $0x20] sm:$0xff] (%p1374_p5), %v985_v17 }
 0x222   : > { %988 = vst [vmem:[%s946_s11 + $0x30] sm:$0xff] %v987_v18 }
 0x223 PF: > { %994 = sbr.rel (!%p1374_p5) target bundleno = 553 (0x229), region = 163  ;;  %s1217_s12 = sshll.u32 (%p1374_p5), %s1355_s16, 3  ;;  %v1031_v19 = vld [vmem:[%s1519_s23] sm:$0xff] (%p1374_p5)  ;;  %v1033_v20 = vld [vmem:[%s1519_s23 + $0x8] sm:$0xff] (%p1374_p5)  ;;  %v1035_v21 = vld [vmem:[%s1519_s23 + $0x10] sm:$0xff] (%p1374_p5) }
 0x224   : > { %s996_s24 = scalar_lea.vmem (%p1374_p5), %s1600_s10, %s1217_s12  ;;  %v1037_v22 = vld [vmem:[%s1519_s23 + $0x18] sm:$0xff] (%p1374_p5) }
 0x225   : > { %1032 = vst [vmem:[%s996_s24] sm:$0xff] (%p1374_p5), %v1031_v19 }
 0x226   : > { %1034 = vst [vmem:[%s996_s24 + $0x10] sm:$0xff] (%p1374_p5), %v1033_v20 }
 0x227   : > { %1036 = vst [vmem:[%s996_s24 + $0x20] sm:$0xff] (%p1374_p5), %v1035_v21 }
 0x228   : > { %1038 = vst [vmem:[%s996_s24 + $0x30] sm:$0xff] %v1037_v22 }
 0x229 PF: > { %p18_p10 = scmp.ge.s32.totalorder %s1358_s17, 4   ;;  %s1603_s13 = smov %s1277_s14 }
 0x22a   : > { %s1604_s14 = smov %s1368_s20  ;;  %s1605_s15 = smov %s1358_s17 }
 0x22b   :  { %20 = sbr.rel (!%p18_p10) target bundleno = 2 (0x2), region = 264 }

</bundles_post_ra>
